<compile_context>
chip_gen: v5e
topology: v5e:2x2
jax: 0.10.0
libtpu: 0.0.40
codegen_flags: <defaults>
</compile_context>

<pallas_src>
import functools

import jax
import jax.numpy as jnp
import numpy as np
from jax import lax
from jax.experimental import pallas as pl
from jax.experimental.pallas import tpu as pltpu


def _gat_fused_kernel(x_ref, w_heads_ref, b_heads_ref, w_out_ref, b_out_ref,
                      mask_ref, o_ref, *, n_heads, batch):
    # x_ref:       [B, N, C]
    # w_heads_ref: [H, C, hid_c]      b_heads_ref: [H, 1, hid_c]
    # w_out_ref:   [H, hid_c, out_c]  b_out_ref:   [1, out_c]
    # mask_ref:    [N, N]  (0/1 f32, = (graph > 0), precomputed in wrapper)
    # o_ref:       [B, N, out_c]
    mask = mask_ref[...]

    def gat_attention(h, bias):
        # h: [N, D], bias: [1, D]  -> softmax( mask-filled(h h^T) ) @ h + bias
        # raw = h @ h^T without materializing a transpose (MXU contracts dim 1
        # of both operands directly).
        raw = lax.dot_general(h, h, (((1,), (1,)), ((), ())),
                              preferred_element_type=jnp.float32)     # [N, N]
        # Exact PyTorch semantics: (raw * mask).masked_fill_(== 0, -1e16).
        # (A genuinely-zero logit on a real edge is also masked -- faithful to
        #  the reference quirk.)
        masked = raw * mask
        scores = jnp.where(masked == 0.0, jnp.float32(-1e16), masked)
        # Softmax over last axis, normalization deferred to the [N, D] PV
        # product instead of the [N, N] probabilities.
        m = jnp.max(scores, axis=-1, keepdims=True)
        p = jnp.exp(scores - m)
        denom = jnp.sum(p, axis=-1, keepdims=True)
        pv = jnp.dot(p, h, preferred_element_type=jnp.float32)        # [N, D]
        return pv * pl.reciprocal(denom, approx=False) + bias

    def leaky_relu(v):                      # nn.LeakyReLU default slope 0.01
        return jnp.where(v >= 0.0, v, 0.01 * v)

    for b in range(batch):                  # static unrolled (B folded grid)
        x = x_ref[b].astype(jnp.float32)    # [N, C]
        h_out = None
        for i in range(n_heads):            # static unrolled
            w_i = w_heads_ref[i]            # [C, hid_c]
            b_i = b_heads_ref[i]            # [1, hid_c]
            h_i = jnp.dot(x, w_i, preferred_element_type=jnp.float32)
            hidden_i = leaky_relu(gat_attention(h_i, b_i))            # [N, hid_c]
            # Output projection accumulated per head -> no on-chip concat.
            contrib = jnp.dot(hidden_i, w_out_ref[i],
                              preferred_element_type=jnp.float32)     # [N, out_c]
            h_out = contrib if h_out is None else h_out + contrib
        out_b = leaky_relu(gat_attention(h_out, b_out_ref[...]))
        o_ref[b] = out_b.astype(o_ref.dtype)


def gat_forward(x, graph, params):
    """Fused GAT forward. x: [B, N, C], graph: [N, N] -> [B, N, out_c]."""
    B, N, C = x.shape
    heads = params["heads"]
    n_heads = len(heads)
    hid_c = heads[0][0].shape[1]
    w_out, b_out = params["out"]
    out_c = w_out.shape[1]

    # Pre-stack / pre-split parameters so the kernel never lane-slices.
    w_heads = jnp.stack([w for (w, _) in heads], axis=0)                # [H, C, hid]
    b_heads = jnp.stack([b.reshape(1, hid_c) for (_, b) in heads], 0)   # [H, 1, hid]
    w_out_split = w_out.reshape(n_heads, hid_c, out_c)                  # [H, hid, out]
    b_out2 = b_out.reshape(1, out_c)
    # Edge mask precomputed once on the host side of the kernel boundary.
    mask = (graph > 0).astype(jnp.float32)                              # [N, N]

    kernel = functools.partial(_gat_fused_kernel, n_heads=n_heads, batch=B)

    # Advisory cost estimate for XLA's scheduler (kernel is launch-bound).
    flops = B * (n_heads * (2 * N * C * hid_c        # x @ W_i
                            + 4 * N * N * hid_c      # h h^T and P @ h
                            + 2 * N * hid_c * out_c) # hidden_i @ W_out_i
                 + 4 * N * N * out_c)                # output-layer attention
    transcendentals = B * (n_heads + 1) * N * N      # exps
    bytes_accessed = 4 * (x.size + w_heads.size + b_heads.size
                          + w_out_split.size + b_out2.size + mask.size
                          + B * N * out_c)

    return pl.pallas_call(
        kernel,
        out_shape=jax.ShapeDtypeStruct((B, N, out_c), jnp.float32),
        grid=(1,),   # batch folded into a single grid step (single-TC friendly)
        in_specs=[
            pl.BlockSpec((B, N, C), lambda i: (0, 0, 0)),                 # x
            pl.BlockSpec((n_heads, C, hid_c), lambda i: (0, 0, 0)),       # W heads
            pl.BlockSpec((n_heads, 1, hid_c), lambda i: (0, 0, 0)),       # b heads
            pl.BlockSpec((n_heads, hid_c, out_c), lambda i: (0, 0, 0)),   # W_out split
            pl.BlockSpec((1, out_c), lambda i: (0, 0)),                   # b_out
            pl.BlockSpec((N, N), lambda i: (0, 0)),                       # edge mask
        ],
        out_specs=pl.BlockSpec((B, N, out_c), lambda i: (0, 0, 0)),
        compiler_params=pltpu.CompilerParams(
            dimension_semantics=("arbitrary",),
        ),
        cost_estimate=pl.CostEstimate(flops=flops,
                                      transcendentals=transcendentals,
                                      bytes_accessed=bytes_accessed),
    )(x, w_heads, b_heads, w_out_split, b_out2, mask)


def init_params(key, in_c, hid_c, out_c, n_heads):
    """Normal init matching nn.init.normal_; weights stored as [in, out]."""
    keys = jax.random.split(key, 2 * n_heads + 2)
    heads = []
    for i in range(n_heads):
        w = jax.random.normal(keys[2 * i], (in_c, hid_c), dtype=jnp.float32)
        b = jax.random.normal(keys[2 * i + 1], (hid_c,), dtype=jnp.float32)
        heads.append((w, b))
    w_out = jax.random.normal(keys[-2], (hid_c * n_heads, out_c), dtype=jnp.float32)
    b_out = jax.random.normal(keys[-1], (out_c,), dtype=jnp.float32)
    return {"heads": heads, "out": (w_out, b_out)}


# ---- pure-JAX reference (mirrors the PyTorch module line-by-line) ----------
def _gat_layer_ref(x, w, b, graph):
    mask = (graph > 0).astype(jnp.float32)
    h = jnp.einsum("bnc,cd->bnd", x, w, precision="highest")
    s = jnp.einsum("bnd,bmd->bnm", h, h, precision="highest") * mask[None]
    s = jnp.where(s == 0.0, -1e16, s)
    a = jax.nn.softmax(s, axis=-1)
    return jnp.einsum("bnm,bmd->bnd", a, h, precision="highest") + b


def gat_forward_ref(x, graph, params):
    hs = [_gat_layer_ref(x, w, b, graph) for (w, b) in params["heads"]]
    hidden = jax.nn.leaky_relu(jnp.concatenate(hs, axis=-1), 0.01)
    w_out, b_out = params["out"]
    return jax.nn.leaky_relu(_gat_layer_ref(hidden, w_out, b_out, graph), 0.01)


if __name__ == "__main__":
    B, N = 2, 16
    in_c, hid_c, out_c, n_heads = 8, 16, 8, 2

    key = jax.random.PRNGKey(0)
    k_x, k_g, k_p = jax.random.split(key, 3)

    x = jax.random.normal(k_x, (B, N, in_c), dtype=jnp.float32)
    # Random sparse-ish adjacency (values > 0 treated as edges), self loops on.
    graph = (jax.random.uniform(k_g, (N, N)) > 0.6).astype(jnp.float32)
    graph = jnp.maximum(graph, jnp.eye(N, dtype=jnp.float32))

    params = init_params(k_p, in_c, hid_c, out_c, n_heads)

    out = gat_forward(x, graph, params)
    jax.block_until_ready(out)
    assert out.shape == (B, N, out_c), out.shape

    ref = gat_forward_ref(x, graph, params)
    np.testing.assert_allclose(np.asarray(out), np.asarray(ref),
                               rtol=2e-2, atol=2e-2)

    print("KERNEL_OK")
</pallas_src>

<mosaic_0001>
module attributes {stable_mosaic.version = 11 : i64} {
  func.func @_gat_fused_kernel(%arg0: i32, %arg1: memref<2x16x8xf32, #tpu.memory_space<vmem>>, %arg2: memref<2x8x16xf32, #tpu.memory_space<vmem>>, %arg3: memref<2x1x16xf32, #tpu.memory_space<vmem>>, %arg4: memref<2x16x8xf32, #tpu.memory_space<vmem>>, %arg5: memref<1x8xf32, #tpu.memory_space<vmem>>, %arg6: memref<16x16xf32, #tpu.memory_space<vmem>>, %arg7: memref<2x16x8xf32, #tpu.memory_space<vmem>>) attributes {dimension_semantics = [#tpu.dimension_semantics<arbitrary>], iteration_bounds = array<i64: 1>, scalar_prefetch = 0 : i64, scratch_operands = 0 : i64, tpu.core_type = #tpu.core_type<tc>, window_params = [{pipeline_mode = #tpu.pipeline_mode<synchronous>, transform_indices = @transform_0, window_bounds = array<i64: 2, 16, 8>}, {pipeline_mode = #tpu.pipeline_mode<synchronous>, transform_indices = @transform_1, window_bounds = array<i64: 2, 8, 16>}, {pipeline_mode = #tpu.pipeline_mode<synchronous>, transform_indices = @transform_2, window_bounds = array<i64: 2, 1, 16>}, {pipeline_mode = #tpu.pipeline_mode<synchronous>, transform_indices = @transform_3, window_bounds = array<i64: 2, 16, 8>}, {pipeline_mode = #tpu.pipeline_mode<synchronous>, transform_indices = @transform_4, window_bounds = array<i64: 1, 8>}, {pipeline_mode = #tpu.pipeline_mode<synchronous>, transform_indices = @transform_5, window_bounds = array<i64: 16, 16>}, {pipeline_mode = #tpu.pipeline_mode<synchronous>, transform_indices = @transform_6, window_bounds = array<i64: 2, 16, 8>}]} {
    %c0 = arith.constant 0 : index
    %c0_0 = arith.constant 0 : index
    %0 = vector.load %arg6[%c0, %c0_0] : memref<16x16xf32, #tpu.memory_space<vmem>>, vector<16x16xf32>
    %c0_1 = arith.constant 0 : index
    %c0_2 = arith.constant 0 : index
    %c0_3 = arith.constant 0 : index
    %1 = vector.load %arg1[%c0_1, %c0_2, %c0_3] : memref<2x16x8xf32, #tpu.memory_space<vmem>>, vector<1x16x8xf32>
    %2 = vector.shape_cast %1 : vector<1x16x8xf32> to vector<16x8xf32>
    %c0_4 = arith.constant 0 : index
    %c0_5 = arith.constant 0 : index
    %c0_6 = arith.constant 0 : index
    %3 = vector.load %arg2[%c0_4, %c0_5, %c0_6] : memref<2x8x16xf32, #tpu.memory_space<vmem>>, vector<1x8x16xf32>
    %4 = vector.shape_cast %3 : vector<1x8x16xf32> to vector<8x16xf32>
    %c0_7 = arith.constant 0 : index
    %c0_8 = arith.constant 0 : index
    %c0_9 = arith.constant 0 : index
    %5 = vector.load %arg3[%c0_7, %c0_8, %c0_9] : memref<2x1x16xf32, #tpu.memory_space<vmem>>, vector<1x1x16xf32>
    %6 = vector.shape_cast %5 : vector<1x1x16xf32> to vector<1x16xf32>
    %cst = arith.constant dense<0.000000e+00> : vector<16x16xf32>
    %7 = tpu.matmul %2, %4, %cst {dimension_numbers = #tpu.dot_dimension_numbers<[1], [0], [0], [1], [0, 0, 1, 1], [], []>} : vector<16x8xf32>, vector<8x16xf32>, vector<16x16xf32> -> vector<16x16xf32>
    %cst_10 = arith.constant dense<0.000000e+00> : vector<16x16xf32>
    %8 = tpu.matmul %7, %7, %cst_10 {dimension_numbers = #tpu.dot_dimension_numbers<[1], [1], [0], [0], [0, 0, 1, 0], [], []>} : vector<16x16xf32>, vector<16x16xf32>, vector<16x16xf32> -> vector<16x16xf32>
    %9 = arith.mulf %8, %0 : vector<16x16xf32>
    %cst_11 = arith.constant 0.000000e+00 : f32
    %10 = vector.broadcast %cst_11 : f32 to vector<16x16xf32>
    %11 = arith.cmpf oeq, %9, %10 : vector<16x16xf32>
    %cst_12 = arith.constant -1.000000e+16 : f32
    %12 = vector.broadcast %cst_12 : f32 to vector<16x16xf32>
    %13 = arith.select %11, %12, %9 : vector<16x16xi1>, vector<16x16xf32>
    %cst_13 = arith.constant dense<0xFF800000> : vector<16xf32>
    %14 = vector.multi_reduction <maximumf>, %13, %cst_13 [1] : vector<16x16xf32> to vector<16xf32>
    %15 = vector.shape_cast %14 : vector<16xf32> to vector<16x1xf32>
    %16 = vector.broadcast %15 : vector<16x1xf32> to vector<16x16xf32>
    %17 = arith.subf %13, %16 : vector<16x16xf32>
    %18 = math.exp %17 : vector<16x16xf32>
    %cst_14 = arith.constant dense<0.000000e+00> : vector<16xf32>
    %19 = vector.multi_reduction <add>, %18, %cst_14 [1] : vector<16x16xf32> to vector<16xf32>
    %20 = vector.shape_cast %19 : vector<16xf32> to vector<16x1xf32>
    %cst_15 = arith.constant dense<0.000000e+00> : vector<16x16xf32>
    %21 = tpu.matmul %18, %7, %cst_15 {dimension_numbers = #tpu.dot_dimension_numbers<[1], [0], [0], [1], [0, 0, 1, 1], [], []>} : vector<16x16xf32>, vector<16x16xf32>, vector<16x16xf32> -> vector<16x16xf32>
    %22 = tpu.reciprocal %20 : vector<16x1xf32> -> vector<16x1xf32>
    %23 = vector.broadcast %22 : vector<16x1xf32> to vector<16x16xf32>
    %24 = arith.mulf %21, %23 : vector<16x16xf32>
    %25 = vector.broadcast %6 : vector<1x16xf32> to vector<16x16xf32>
    %26 = arith.addf %24, %25 : vector<16x16xf32>
    %cst_16 = arith.constant 0.000000e+00 : f32
    %27 = vector.broadcast %cst_16 : f32 to vector<16x16xf32>
    %28 = arith.cmpf oge, %26, %27 : vector<16x16xf32>
    %cst_17 = arith.constant 0.00999999977 : f32
    %29 = vector.broadcast %cst_17 : f32 to vector<16x16xf32>
    %30 = arith.mulf %29, %26 : vector<16x16xf32>
    %31 = arith.select %28, %26, %30 : vector<16x16xi1>, vector<16x16xf32>
    %c0_18 = arith.constant 0 : index
    %c0_19 = arith.constant 0 : index
    %c0_20 = arith.constant 0 : index
    %32 = vector.load %arg4[%c0_18, %c0_19, %c0_20] : memref<2x16x8xf32, #tpu.memory_space<vmem>>, vector<1x16x8xf32>
    %33 = vector.shape_cast %32 : vector<1x16x8xf32> to vector<16x8xf32>
    %cst_21 = arith.constant dense<0.000000e+00> : vector<16x8xf32>
    %34 = tpu.matmul %31, %33, %cst_21 {dimension_numbers = #tpu.dot_dimension_numbers<[1], [0], [0], [1], [0, 0, 1, 1], [], []>} : vector<16x16xf32>, vector<16x8xf32>, vector<16x8xf32> -> vector<16x8xf32>
    %c1 = arith.constant 1 : index
    %c0_22 = arith.constant 0 : index
    %c0_23 = arith.constant 0 : index
    %35 = vector.load %arg2[%c1, %c0_22, %c0_23] : memref<2x8x16xf32, #tpu.memory_space<vmem>>, vector<1x8x16xf32>
    %36 = vector.shape_cast %35 : vector<1x8x16xf32> to vector<8x16xf32>
    %c1_24 = arith.constant 1 : index
    %c0_25 = arith.constant 0 : index
    %c0_26 = arith.constant 0 : index
    %37 = vector.load %arg3[%c1_24, %c0_25, %c0_26] : memref<2x1x16xf32, #tpu.memory_space<vmem>>, vector<1x1x16xf32>
    %38 = vector.shape_cast %37 : vector<1x1x16xf32> to vector<1x16xf32>
    %cst_27 = arith.constant dense<0.000000e+00> : vector<16x16xf32>
    %39 = tpu.matmul %2, %36, %cst_27 {dimension_numbers = #tpu.dot_dimension_numbers<[1], [0], [0], [1], [0, 0, 1, 1], [], []>} : vector<16x8xf32>, vector<8x16xf32>, vector<16x16xf32> -> vector<16x16xf32>
    %cst_28 = arith.constant dense<0.000000e+00> : vector<16x16xf32>
    %40 = tpu.matmul %39, %39, %cst_28 {dimension_numbers = #tpu.dot_dimension_numbers<[1], [1], [0], [0], [0, 0, 1, 0], [], []>} : vector<16x16xf32>, vector<16x16xf32>, vector<16x16xf32> -> vector<16x16xf32>
    %41 = arith.mulf %40, %0 : vector<16x16xf32>
    %cst_29 = arith.constant 0.000000e+00 : f32
    %42 = vector.broadcast %cst_29 : f32 to vector<16x16xf32>
    %43 = arith.cmpf oeq, %41, %42 : vector<16x16xf32>
    %cst_30 = arith.constant -1.000000e+16 : f32
    %44 = vector.broadcast %cst_30 : f32 to vector<16x16xf32>
    %45 = arith.select %43, %44, %41 : vector<16x16xi1>, vector<16x16xf32>
    %cst_31 = arith.constant dense<0xFF800000> : vector<16xf32>
    %46 = vector.multi_reduction <maximumf>, %45, %cst_31 [1] : vector<16x16xf32> to vector<16xf32>
    %47 = vector.shape_cast %46 : vector<16xf32> to vector<16x1xf32>
    %48 = vector.broadcast %47 : vector<16x1xf32> to vector<16x16xf32>
    %49 = arith.subf %45, %48 : vector<16x16xf32>
    %50 = math.exp %49 : vector<16x16xf32>
    %cst_32 = arith.constant dense<0.000000e+00> : vector<16xf32>
    %51 = vector.multi_reduction <add>, %50, %cst_32 [1] : vector<16x16xf32> to vector<16xf32>
    %52 = vector.shape_cast %51 : vector<16xf32> to vector<16x1xf32>
    %cst_33 = arith.constant dense<0.000000e+00> : vector<16x16xf32>
    %53 = tpu.matmul %50, %39, %cst_33 {dimension_numbers = #tpu.dot_dimension_numbers<[1], [0], [0], [1], [0, 0, 1, 1], [], []>} : vector<16x16xf32>, vector<16x16xf32>, vector<16x16xf32> -> vector<16x16xf32>
    %54 = tpu.reciprocal %52 : vector<16x1xf32> -> vector<16x1xf32>
    %55 = vector.broadcast %54 : vector<16x1xf32> to vector<16x16xf32>
    %56 = arith.mulf %53, %55 : vector<16x16xf32>
    %57 = vector.broadcast %38 : vector<1x16xf32> to vector<16x16xf32>
    %58 = arith.addf %56, %57 : vector<16x16xf32>
    %cst_34 = arith.constant 0.000000e+00 : f32
    %59 = vector.broadcast %cst_34 : f32 to vector<16x16xf32>
    %60 = arith.cmpf oge, %58, %59 : vector<16x16xf32>
    %cst_35 = arith.constant 0.00999999977 : f32
    %61 = vector.broadcast %cst_35 : f32 to vector<16x16xf32>
    %62 = arith.mulf %61, %58 : vector<16x16xf32>
    %63 = arith.select %60, %58, %62 : vector<16x16xi1>, vector<16x16xf32>
    %c1_36 = arith.constant 1 : index
    %c0_37 = arith.constant 0 : index
    %c0_38 = arith.constant 0 : index
    %64 = vector.load %arg4[%c1_36, %c0_37, %c0_38] : memref<2x16x8xf32, #tpu.memory_space<vmem>>, vector<1x16x8xf32>
    %65 = vector.shape_cast %64 : vector<1x16x8xf32> to vector<16x8xf32>
    %cst_39 = arith.constant dense<0.000000e+00> : vector<16x8xf32>
    %66 = tpu.matmul %63, %65, %cst_39 {dimension_numbers = #tpu.dot_dimension_numbers<[1], [0], [0], [1], [0, 0, 1, 1], [], []>} : vector<16x16xf32>, vector<16x8xf32>, vector<16x8xf32> -> vector<16x8xf32>
    %67 = arith.addf %34, %66 : vector<16x8xf32>
    %c0_40 = arith.constant 0 : index
    %c0_41 = arith.constant 0 : index
    %68 = vector.load %arg5[%c0_40, %c0_41] : memref<1x8xf32, #tpu.memory_space<vmem>>, vector<1x8xf32>
    %cst_42 = arith.constant dense<0.000000e+00> : vector<16x16xf32>
    %69 = tpu.matmul %67, %67, %cst_42 {dimension_numbers = #tpu.dot_dimension_numbers<[1], [1], [0], [0], [0, 0, 1, 0], [], []>} : vector<16x8xf32>, vector<16x8xf32>, vector<16x16xf32> -> vector<16x16xf32>
    %70 = arith.mulf %69, %0 : vector<16x16xf32>
    %cst_43 = arith.constant 0.000000e+00 : f32
    %71 = vector.broadcast %cst_43 : f32 to vector<16x16xf32>
    %72 = arith.cmpf oeq, %70, %71 : vector<16x16xf32>
    %cst_44 = arith.constant -1.000000e+16 : f32
    %73 = vector.broadcast %cst_44 : f32 to vector<16x16xf32>
    %74 = arith.select %72, %73, %70 : vector<16x16xi1>, vector<16x16xf32>
    %cst_45 = arith.constant dense<0xFF800000> : vector<16xf32>
    %75 = vector.multi_reduction <maximumf>, %74, %cst_45 [1] : vector<16x16xf32> to vector<16xf32>
    %76 = vector.shape_cast %75 : vector<16xf32> to vector<16x1xf32>
    %77 = vector.broadcast %76 : vector<16x1xf32> to vector<16x16xf32>
    %78 = arith.subf %74, %77 : vector<16x16xf32>
    %79 = math.exp %78 : vector<16x16xf32>
    %cst_46 = arith.constant dense<0.000000e+00> : vector<16xf32>
    %80 = vector.multi_reduction <add>, %79, %cst_46 [1] : vector<16x16xf32> to vector<16xf32>
    %81 = vector.shape_cast %80 : vector<16xf32> to vector<16x1xf32>
    %cst_47 = arith.constant dense<0.000000e+00> : vector<16x8xf32>
    %82 = tpu.matmul %79, %67, %cst_47 {dimension_numbers = #tpu.dot_dimension_numbers<[1], [0], [0], [1], [0, 0, 1, 1], [], []>} : vector<16x16xf32>, vector<16x8xf32>, vector<16x8xf32> -> vector<16x8xf32>
    %83 = tpu.reciprocal %81 : vector<16x1xf32> -> vector<16x1xf32>
    %84 = vector.broadcast %83 : vector<16x1xf32> to vector<16x8xf32>
    %85 = arith.mulf %82, %84 : vector<16x8xf32>
    %86 = vector.broadcast %68 : vector<1x8xf32> to vector<16x8xf32>
    %87 = arith.addf %85, %86 : vector<16x8xf32>
    %cst_48 = arith.constant 0.000000e+00 : f32
    %88 = vector.broadcast %cst_48 : f32 to vector<16x8xf32>
    %89 = arith.cmpf oge, %87, %88 : vector<16x8xf32>
    %cst_49 = arith.constant 0.00999999977 : f32
    %90 = vector.broadcast %cst_49 : f32 to vector<16x8xf32>
    %91 = arith.mulf %90, %87 : vector<16x8xf32>
    %92 = arith.select %89, %87, %91 : vector<16x8xi1>, vector<16x8xf32>
    %c0_50 = arith.constant 0 : index
    %c0_51 = arith.constant 0 : index
    %c0_52 = arith.constant 0 : index
    %93 = vector.load %arg7[%c0_50, %c0_51, %c0_52] : memref<2x16x8xf32, #tpu.memory_space<vmem>>, vector<1x16x8xf32>
    %94 = vector.shape_cast %93 : vector<1x16x8xf32> to vector<16x8xf32>
    %95 = vector.shape_cast %92 : vector<16x8xf32> to vector<1x16x8xf32>
    tpu.vector_store %arg7[%c0_50, %c0_51, %c0_52], %95 {strides = array<i32>} : memref<2x16x8xf32, #tpu.memory_space<vmem>>, vector<1x16x8xf32>,
    %c1_53 = arith.constant 1 : index
    %c0_54 = arith.constant 0 : index
    %c0_55 = arith.constant 0 : index
    %96 = vector.load %arg1[%c1_53, %c0_54, %c0_55] : memref<2x16x8xf32, #tpu.memory_space<vmem>>, vector<1x16x8xf32>
    %97 = vector.shape_cast %96 : vector<1x16x8xf32> to vector<16x8xf32>
    %c0_56 = arith.constant 0 : index
    %c0_57 = arith.constant 0 : index
    %c0_58 = arith.constant 0 : index
    %98 = vector.load %arg2[%c0_56, %c0_57, %c0_58] : memref<2x8x16xf32, #tpu.memory_space<vmem>>, vector<1x8x16xf32>
    %99 = vector.shape_cast %98 : vector<1x8x16xf32> to vector<8x16xf32>
    %c0_59 = arith.constant 0 : index
    %c0_60 = arith.constant 0 : index
    %c0_61 = arith.constant 0 : index
    %100 = vector.load %arg3[%c0_59, %c0_60, %c0_61] : memref<2x1x16xf32, #tpu.memory_space<vmem>>, vector<1x1x16xf32>
    %101 = vector.shape_cast %100 : vector<1x1x16xf32> to vector<1x16xf32>
    %cst_62 = arith.constant dense<0.000000e+00> : vector<16x16xf32>
    %102 = tpu.matmul %97, %99, %cst_62 {dimension_numbers = #tpu.dot_dimension_numbers<[1], [0], [0], [1], [0, 0, 1, 1], [], []>} : vector<16x8xf32>, vector<8x16xf32>, vector<16x16xf32> -> vector<16x16xf32>
    %cst_63 = arith.constant dense<0.000000e+00> : vector<16x16xf32>
    %103 = tpu.matmul %102, %102, %cst_63 {dimension_numbers = #tpu.dot_dimension_numbers<[1], [1], [0], [0], [0, 0, 1, 0], [], []>} : vector<16x16xf32>, vector<16x16xf32>, vector<16x16xf32> -> vector<16x16xf32>
    %104 = arith.mulf %103, %0 : vector<16x16xf32>
    %cst_64 = arith.constant 0.000000e+00 : f32
    %105 = vector.broadcast %cst_64 : f32 to vector<16x16xf32>
    %106 = arith.cmpf oeq, %104, %105 : vector<16x16xf32>
    %cst_65 = arith.constant -1.000000e+16 : f32
    %107 = vector.broadcast %cst_65 : f32 to vector<16x16xf32>
    %108 = arith.select %106, %107, %104 : vector<16x16xi1>, vector<16x16xf32>
    %cst_66 = arith.constant dense<0xFF800000> : vector<16xf32>
    %109 = vector.multi_reduction <maximumf>, %108, %cst_66 [1] : vector<16x16xf32> to vector<16xf32>
    %110 = vector.shape_cast %109 : vector<16xf32> to vector<16x1xf32>
    %111 = vector.broadcast %110 : vector<16x1xf32> to vector<16x16xf32>
    %112 = arith.subf %108, %111 : vector<16x16xf32>
    %113 = math.exp %112 : vector<16x16xf32>
    %cst_67 = arith.constant dense<0.000000e+00> : vector<16xf32>
    %114 = vector.multi_reduction <add>, %113, %cst_67 [1] : vector<16x16xf32> to vector<16xf32>
    %115 = vector.shape_cast %114 : vector<16xf32> to vector<16x1xf32>
    %cst_68 = arith.constant dense<0.000000e+00> : vector<16x16xf32>
    %116 = tpu.matmul %113, %102, %cst_68 {dimension_numbers = #tpu.dot_dimension_numbers<[1], [0], [0], [1], [0, 0, 1, 1], [], []>} : vector<16x16xf32>, vector<16x16xf32>, vector<16x16xf32> -> vector<16x16xf32>
    %117 = tpu.reciprocal %115 : vector<16x1xf32> -> vector<16x1xf32>
    %118 = vector.broadcast %117 : vector<16x1xf32> to vector<16x16xf32>
    %119 = arith.mulf %116, %118 : vector<16x16xf32>
    %120 = vector.broadcast %101 : vector<1x16xf32> to vector<16x16xf32>
    %121 = arith.addf %119, %120 : vector<16x16xf32>
    %cst_69 = arith.constant 0.000000e+00 : f32
    %122 = vector.broadcast %cst_69 : f32 to vector<16x16xf32>
    %123 = arith.cmpf oge, %121, %122 : vector<16x16xf32>
    %cst_70 = arith.constant 0.00999999977 : f32
    %124 = vector.broadcast %cst_70 : f32 to vector<16x16xf32>
    %125 = arith.mulf %124, %121 : vector<16x16xf32>
    %126 = arith.select %123, %121, %125 : vector<16x16xi1>, vector<16x16xf32>
    %c0_71 = arith.constant 0 : index
    %c0_72 = arith.constant 0 : index
    %c0_73 = arith.constant 0 : index
    %127 = vector.load %arg4[%c0_71, %c0_72, %c0_73] : memref<2x16x8xf32, #tpu.memory_space<vmem>>, vector<1x16x8xf32>
    %128 = vector.shape_cast %127 : vector<1x16x8xf32> to vector<16x8xf32>
    %cst_74 = arith.constant dense<0.000000e+00> : vector<16x8xf32>
    %129 = tpu.matmul %126, %128, %cst_74 {dimension_numbers = #tpu.dot_dimension_numbers<[1], [0], [0], [1], [0, 0, 1, 1], [], []>} : vector<16x16xf32>, vector<16x8xf32>, vector<16x8xf32> -> vector<16x8xf32>
    %c1_75 = arith.constant 1 : index
    %c0_76 = arith.constant 0 : index
    %c0_77 = arith.constant 0 : index
    %130 = vector.load %arg2[%c1_75, %c0_76, %c0_77] : memref<2x8x16xf32, #tpu.memory_space<vmem>>, vector<1x8x16xf32>
    %131 = vector.shape_cast %130 : vector<1x8x16xf32> to vector<8x16xf32>
    %c1_78 = arith.constant 1 : index
    %c0_79 = arith.constant 0 : index
    %c0_80 = arith.constant 0 : index
    %132 = vector.load %arg3[%c1_78, %c0_79, %c0_80] : memref<2x1x16xf32, #tpu.memory_space<vmem>>, vector<1x1x16xf32>
    %133 = vector.shape_cast %132 : vector<1x1x16xf32> to vector<1x16xf32>
    %cst_81 = arith.constant dense<0.000000e+00> : vector<16x16xf32>
    %134 = tpu.matmul %97, %131, %cst_81 {dimension_numbers = #tpu.dot_dimension_numbers<[1], [0], [0], [1], [0, 0, 1, 1], [], []>} : vector<16x8xf32>, vector<8x16xf32>, vector<16x16xf32> -> vector<16x16xf32>
    %cst_82 = arith.constant dense<0.000000e+00> : vector<16x16xf32>
    %135 = tpu.matmul %134, %134, %cst_82 {dimension_numbers = #tpu.dot_dimension_numbers<[1], [1], [0], [0], [0, 0, 1, 0], [], []>} : vector<16x16xf32>, vector<16x16xf32>, vector<16x16xf32> -> vector<16x16xf32>
    %136 = arith.mulf %135, %0 : vector<16x16xf32>
    %cst_83 = arith.constant 0.000000e+00 : f32
    %137 = vector.broadcast %cst_83 : f32 to vector<16x16xf32>
    %138 = arith.cmpf oeq, %136, %137 : vector<16x16xf32>
    %cst_84 = arith.constant -1.000000e+16 : f32
    %139 = vector.broadcast %cst_84 : f32 to vector<16x16xf32>
    %140 = arith.select %138, %139, %136 : vector<16x16xi1>, vector<16x16xf32>
    %cst_85 = arith.constant dense<0xFF800000> : vector<16xf32>
    %141 = vector.multi_reduction <maximumf>, %140, %cst_85 [1] : vector<16x16xf32> to vector<16xf32>
    %142 = vector.shape_cast %141 : vector<16xf32> to vector<16x1xf32>
    %143 = vector.broadcast %142 : vector<16x1xf32> to vector<16x16xf32>
    %144 = arith.subf %140, %143 : vector<16x16xf32>
    %145 = math.exp %144 : vector<16x16xf32>
    %cst_86 = arith.constant dense<0.000000e+00> : vector<16xf32>
    %146 = vector.multi_reduction <add>, %145, %cst_86 [1] : vector<16x16xf32> to vector<16xf32>
    %147 = vector.shape_cast %146 : vector<16xf32> to vector<16x1xf32>
    %cst_87 = arith.constant dense<0.000000e+00> : vector<16x16xf32>
    %148 = tpu.matmul %145, %134, %cst_87 {dimension_numbers = #tpu.dot_dimension_numbers<[1], [0], [0], [1], [0, 0, 1, 1], [], []>} : vector<16x16xf32>, vector<16x16xf32>, vector<16x16xf32> -> vector<16x16xf32>
    %149 = tpu.reciprocal %147 : vector<16x1xf32> -> vector<16x1xf32>
    %150 = vector.broadcast %149 : vector<16x1xf32> to vector<16x16xf32>
    %151 = arith.mulf %148, %150 : vector<16x16xf32>
    %152 = vector.broadcast %133 : vector<1x16xf32> to vector<16x16xf32>
    %153 = arith.addf %151, %152 : vector<16x16xf32>
    %cst_88 = arith.constant 0.000000e+00 : f32
    %154 = vector.broadcast %cst_88 : f32 to vector<16x16xf32>
    %155 = arith.cmpf oge, %153, %154 : vector<16x16xf32>
    %cst_89 = arith.constant 0.00999999977 : f32
    %156 = vector.broadcast %cst_89 : f32 to vector<16x16xf32>
    %157 = arith.mulf %156, %153 : vector<16x16xf32>
    %158 = arith.select %155, %153, %157 : vector<16x16xi1>, vector<16x16xf32>
    %c1_90 = arith.constant 1 : index
    %c0_91 = arith.constant 0 : index
    %c0_92 = arith.constant 0 : index
    %159 = vector.load %arg4[%c1_90, %c0_91, %c0_92] : memref<2x16x8xf32, #tpu.memory_space<vmem>>, vector<1x16x8xf32>
    %160 = vector.shape_cast %159 : vector<1x16x8xf32> to vector<16x8xf32>
    %cst_93 = arith.constant dense<0.000000e+00> : vector<16x8xf32>
    %161 = tpu.matmul %158, %160, %cst_93 {dimension_numbers = #tpu.dot_dimension_numbers<[1], [0], [0], [1], [0, 0, 1, 1], [], []>} : vector<16x16xf32>, vector<16x8xf32>, vector<16x8xf32> -> vector<16x8xf32>
    %162 = arith.addf %129, %161 : vector<16x8xf32>
    %c0_94 = arith.constant 0 : index
    %c0_95 = arith.constant 0 : index
    %163 = vector.load %arg5[%c0_94, %c0_95] : memref<1x8xf32, #tpu.memory_space<vmem>>, vector<1x8xf32>
    %cst_96 = arith.constant dense<0.000000e+00> : vector<16x16xf32>
    %164 = tpu.matmul %162, %162, %cst_96 {dimension_numbers = #tpu.dot_dimension_numbers<[1], [1], [0], [0], [0, 0, 1, 0], [], []>} : vector<16x8xf32>, vector<16x8xf32>, vector<16x16xf32> -> vector<16x16xf32>
    %165 = arith.mulf %164, %0 : vector<16x16xf32>
    %cst_97 = arith.constant 0.000000e+00 : f32
    %166 = vector.broadcast %cst_97 : f32 to vector<16x16xf32>
    %167 = arith.cmpf oeq, %165, %166 : vector<16x16xf32>
    %cst_98 = arith.constant -1.000000e+16 : f32
    %168 = vector.broadcast %cst_98 : f32 to vector<16x16xf32>
    %169 = arith.select %167, %168, %165 : vector<16x16xi1>, vector<16x16xf32>
    %cst_99 = arith.constant dense<0xFF800000> : vector<16xf32>
    %170 = vector.multi_reduction <maximumf>, %169, %cst_99 [1] : vector<16x16xf32> to vector<16xf32>
    %171 = vector.shape_cast %170 : vector<16xf32> to vector<16x1xf32>
    %172 = vector.broadcast %171 : vector<16x1xf32> to vector<16x16xf32>
    %173 = arith.subf %169, %172 : vector<16x16xf32>
    %174 = math.exp %173 : vector<16x16xf32>
    %cst_100 = arith.constant dense<0.000000e+00> : vector<16xf32>
    %175 = vector.multi_reduction <add>, %174, %cst_100 [1] : vector<16x16xf32> to vector<16xf32>
    %176 = vector.shape_cast %175 : vector<16xf32> to vector<16x1xf32>
    %cst_101 = arith.constant dense<0.000000e+00> : vector<16x8xf32>
    %177 = tpu.matmul %174, %162, %cst_101 {dimension_numbers = #tpu.dot_dimension_numbers<[1], [0], [0], [1], [0, 0, 1, 1], [], []>} : vector<16x16xf32>, vector<16x8xf32>, vector<16x8xf32> -> vector<16x8xf32>
    %178 = tpu.reciprocal %176 : vector<16x1xf32> -> vector<16x1xf32>
    %179 = vector.broadcast %178 : vector<16x1xf32> to vector<16x8xf32>
    %180 = arith.mulf %177, %179 : vector<16x8xf32>
    %181 = vector.broadcast %163 : vector<1x8xf32> to vector<16x8xf32>
    %182 = arith.addf %180, %181 : vector<16x8xf32>
    %cst_102 = arith.constant 0.000000e+00 : f32
    %183 = vector.broadcast %cst_102 : f32 to vector<16x8xf32>
    %184 = arith.cmpf oge, %182, %183 : vector<16x8xf32>
    %cst_103 = arith.constant 0.00999999977 : f32
    %185 = vector.broadcast %cst_103 : f32 to vector<16x8xf32>
    %186 = arith.mulf %185, %182 : vector<16x8xf32>
    %187 = arith.select %184, %182, %186 : vector<16x8xi1>, vector<16x8xf32>
    %c1_104 = arith.constant 1 : index
    %c0_105 = arith.constant 0 : index
    %c0_106 = arith.constant 0 : index
    %188 = vector.load %arg7[%c1_104, %c0_105, %c0_106] : memref<2x16x8xf32, #tpu.memory_space<vmem>>, vector<1x16x8xf32>
    %189 = vector.shape_cast %188 : vector<1x16x8xf32> to vector<16x8xf32>
    %190 = vector.shape_cast %187 : vector<16x8xf32> to vector<1x16x8xf32>
    tpu.vector_store %arg7[%c1_104, %c0_105, %c0_106], %190 {strides = array<i32>} : memref<2x16x8xf32, #tpu.memory_space<vmem>>, vector<1x16x8xf32>,
    return
  }
  func.func @transform_0(%arg0: i32) -> (i32, i32, i32) {
    %c0_i32 = arith.constant 0 : i32
    %c0_i32_0 = arith.constant 0 : i32
    %c0_i32_1 = arith.constant 0 : i32
    %c0_i32_2 = arith.constant 0 : i32
    return %c0_i32, %c0_i32_0, %c0_i32_1 : i32, i32, i32
  }
  func.func @transform_1(%arg0: i32) -> (i32, i32, i32) {
    %c0_i32 = arith.constant 0 : i32
    %c0_i32_0 = arith.constant 0 : i32
    %c0_i32_1 = arith.constant 0 : i32
    %c0_i32_2 = arith.constant 0 : i32
    return %c0_i32, %c0_i32_0, %c0_i32_1 : i32, i32, i32
  }
  func.func @transform_2(%arg0: i32) -> (i32, i32, i32) {
    %c0_i32 = arith.constant 0 : i32
    %c0_i32_0 = arith.constant 0 : i32
    %c0_i32_1 = arith.constant 0 : i32
    %c0_i32_2 = arith.constant 0 : i32
    return %c0_i32, %c0_i32_0, %c0_i32_1 : i32, i32, i32
  }
  func.func @transform_3(%arg0: i32) -> (i32, i32, i32) {
    %c0_i32 = arith.constant 0 : i32
    %c0_i32_0 = arith.constant 0 : i32
    %c0_i32_1 = arith.constant 0 : i32
    %c0_i32_2 = arith.constant 0 : i32
    return %c0_i32, %c0_i32_0, %c0_i32_1 : i32, i32, i32
  }
  func.func @transform_4(%arg0: i32) -> (i32, i32) {
    %c0_i32 = arith.constant 0 : i32
    %c0_i32_0 = arith.constant 0 : i32
    %c0_i32_1 = arith.constant 0 : i32
    return %c0_i32, %c0_i32_0 : i32, i32
  }
  func.func @transform_5(%arg0: i32) -> (i32, i32) {
    %c0_i32 = arith.constant 0 : i32
    %c0_i32_0 = arith.constant 0 : i32
    %c0_i32_1 = arith.constant 0 : i32
    return %c0_i32, %c0_i32_0 : i32, i32
  }
  func.func @transform_6(%arg0: i32) -> (i32, i32, i32) {
    %c0_i32 = arith.constant 0 : i32
    %c0_i32_0 = arith.constant 0 : i32
    %c0_i32_1 = arith.constant 0 : i32
    %c0_i32_2 = arith.constant 0 : i32
    return %c0_i32, %c0_i32_0, %c0_i32_1 : i32, i32, i32
  }
}

</mosaic_0001>

<bundles_post_ra>
// kernel: tpu_custom_call.1
= control target key start
LH: loop header
LB: loop body
LE: loop exit
PB: predicated region body
PF: predicated region fallthrough
CT: control target
= control target key end

     0   :  { %vm29_vm0 = vcmask 64512   ;;  %vm59_vm1 = vcmask 130048   ;;  %s1377_s1 = inlined_call_operand.vmem [shape: f32[2,8,16], index: 1, kind: input, shape index: {}]   ;;  %s1378_s0 = inlined_call_operand.vmem [shape: f32[2,16,8], index: 0, kind: input, shape index: {}]   ;;  %s1379_s5 = inlined_call_operand.vmem [shape: f32[16,16], index: 5, kind: input, shape index: {}]   ;;  %s1380_s2 = inlined_call_operand.vmem [shape: f32[2,1,16], index: 2, kind: input, shape index: {}]   ;;  %s1381_s3 = inlined_call_operand.vmem [shape: f32[2,16,8], index: 3, kind: input, shape index: {}]   ;;  %s1382_s4 = inlined_call_operand.vmem [shape: f32[1,8], index: 4, kind: input, shape index: {}]   ;;  %s1383_s6 = inlined_call_operand.vmem [shape: f32[2,16,8], index: 6, kind: output, shape index: {}]  }
   0x1   :  { %v1176_v0 = vld [vmem:[%s1377_s1] sm:$0xff]  ;;  %v1181_v1 = vld [vmem:[%s1377_s1 + $0x8] sm:$0xff]  ;;  %v1232_v46 = vld [vmem:[%s1381_s3 + $0x18] sm:$0xff] }
   0x2   :  { %v25_v2 = vld [vmem:[%s1378_s0] sm:$0xff]  ;;  %51 = vmatpush.msra.mxu0 %v1176_v0  ;;  %204 = vmatpush.msra.mxu3 %v1181_v1  ;;  %v26_v3 = vld [vmem:[%s1378_s0 + $0x8] sm:$0xff]  ;;  %v1238_v47 = vld [vmem:[%s1381_s3 + $0x10] sm:$0xff] }
   0x3   :  { %1020 = vmatmul.msk.f32.vlgmr.msra.gmra.mxu0 %vm29_vm0, %v25_v2  ;;  %1030 = vmatmul.msk.f32.vlgmr.msra.gmra.mxu3 %vm29_vm0, %v25_v2  ;;  %v1206_v9 = vld [vmem:[%s1379_s5] sm:$0xff]  ;;  %v1214_v15 = vld [vmem:[%s1379_s5 + $0x8] sm:$0xff] }
   0x4   :  { %v1245_v48 = vld [vmem:[%s1381_s3 + $0x8] sm:$0xff]  ;;  %v1251_v50 = vld [vmem:[%s1381_s3] sm:$0xff] }
   0xb   :  { %1021 = vmatmul.msk.f32.gmra.mxu0 %vm29_vm0, %v26_v3  ;;  %1031 = vmatmul.msk.f32.gmra.mxu3 %vm29_vm0, %v26_v3  ;;  %v1084_v3 = vld [vmem:[%s1380_s2 + $0x1] ss:$0 sm:$0xff] }
  0x80   :  { %v53_v4 = vpop.f32.mrf.mxu0 }
  0x86   :  { %v206_v5 = vpop.f32.mrf.mxu3 }
  0x88   :  { %v56_v6 = vpop.f32.mrf.mxu0 }
  0x89   :  { %1022 = vmatpush.xpose.msk.msra.mxu1 %vm59_vm1, %v56_v6  ;;  %133 = vmatpush.msra.mxu2 %v56_v6 }
  0x8b   :  { %134 = vmatpush.msra.mxu2 %v53_v4 }
  0x8d   :  { %1023 = vmatpush.xpose.msk.msra.mxu1 %vm59_vm1, %v53_v4  ;;  %358 = vmatpush.msrb.mxu2 %v1232_v46 }
  0x8e   :  { %v209_v7 = vpop.f32.mrf.mxu3 }
  0x8f   :  { %1032 = vmatpush.xpose.msk.msrb.mxu0 %vm59_vm1, %v209_v7  ;;  %285 = vmatpush.msrb.mxu3 %v209_v7 }
  0x90   :  { %1024 = vmatmul.msk.f32.vlgmr.msra.gmra.mxu1 %vm59_vm1, %v53_v4  ;;  %359 = vmatpush.msrb.mxu2 %v1238_v47 }
  0x91   :  { %286 = vmatpush.msrb.mxu3 %v206_v5  ;;  %387 = vmatpush.msrb.mxu1 %v1245_v48 }
  0x93   :  { %1033 = vmatpush.xpose.msk.msrb.mxu0 %vm59_vm1, %v206_v5  ;;  %388 = vmatpush.msrb.mxu1 %v1251_v50 }
  0x96   :  { %1034 = vmatmul.msk.f32.vlgmr.msrb.gmra.mxu0 %vm59_vm1, %v206_v5 }
  0x98   :  { %1025 = vmatmul.msk.f32.gmra.mxu1 %vm59_vm1, %v56_v6 }
  0x9e   :  { %1035 = vmatmul.msk.f32.gmra.mxu0 %vm59_vm1, %v209_v7 }
 0x10d   :  { %v83_v8 = vpop.f32.mrf.mxu1 }
 0x10e   :  { %v89_v12 = vmul.f32 %v83_v8, %v1206_v9 }
 0x110   :  { %vm91_vm3 = vcmp.eq.f32.partialorder %v89_v12, 0.0 }
 0x111   :  { %v93_v19 = vsel %vm91_vm3, -1e+16, %v89_v12 }
 0x112   :  { %v95_v23 = vsel %vm59_vm1, %v93_v19, -inf }
 0x113   :  { %v235_v10 = vpop.f32.mrf.mxu0 }
 0x114   :  { %v241_v11 = vmul.f32 %v235_v10, %v1206_v9 }
 0x115   :  { %v86_v16 = vpop.f32.mrf.mxu1 }
 0x116   :  { %vm243_vm2 = vcmp.eq.f32.partialorder %v241_v11, 0.0  ;;  %v90_v20 = vmul.f32 %v86_v16, %v1214_v15 }
 0x117   :  { %v245_v13 = vsel %vm243_vm2, -1e+16, %v241_v11 }
 0x118   :  { %v247_v14 = vsel %vm59_vm1, %v245_v13, -inf  ;;  %vm92_vm5 = vcmp.eq.f32.partialorder %v90_v20, 0.0 }
 0x119   :  { %248 = vmax.xlane.f32.xlu0 %v247_v14  ;;  %v94_v24 = vsel %vm92_vm5, -1e+16, %v90_v20 }
 0x11a   :  { %v98_v25 = vsel %vm59_vm1, %v94_v24, -inf }
 0x11b   :  { %v238_v17 = vpop.f32.mrf.mxu0 }
 0x11c   :  { %v242_v18 = vmul.f32 %v238_v17, %v1214_v15 }
 0x11e   :  { %vm244_vm4 = vcmp.eq.f32.partialorder %v242_v18, 0.0 }
 0x11f   :  { %v246_v21 = vsel %vm244_vm4, -1e+16, %v242_v18 }
 0x120   :  { %v250_v22 = vsel %vm59_vm1, %v246_v21, -inf }
 0x121   :  { %251 = vmax.xlane.f32.xlu1 %v250_v22  ;;  %96 = vmax.xlane.f32.xlu0 %v95_v23 }
 0x129   :  { %99 = vmax.xlane.f32.xlu1 %v98_v25 }
 0x18c   :  { %v249_v26 = vpop.xlane.xlu0 %248 }
 0x18d   :  { %v253_v27 = vsub.f32 %v245_v13, %v249_v26 }
 0x18f   :  { %v255_v28 = vmul.f32 1.442695, %v253_v27 }
 0x191   :  { %1090 = vpow2.f32 %v255_v28 }
 0x194   :  { %v252_v29 = vpop.xlane.xlu1 %251  ;;  %v97_v30 = vpop.xlane.xlu0 %96 }
 0x195   :  { %v254_v31 = vsub.f32 %v246_v21, %v252_v29  ;;  %v101_v32 = vsub.f32 %v93_v19, %v97_v30  ;;  %v1085_v30 = vld [vmem:[%s1380_s2] ss:$0 sm:$0xff] }
 0x197   :  { %v1091_v33 = vpop.eup %1090  ;;  %v257_v34 = vmul.f32 1.442695, %v254_v31  ;;  %v103_v35 = vmul.f32 1.442695, %v101_v32 }
 0x198   :  { %1036 = vmatmul.msk.f32.vlgmr.msrb.gmra.mxu3 %vm59_vm1, %v1091_v33  ;;  %v259_v36 = vsel %vm59_vm1, %v1091_v33, 0.0 }
 0x199   :  { %1092 = vpow2.f32 %v257_v34  ;;  %260 = vadd.xlane.f32.xlu2 %v259_v36 }
 0x19a   :  { %1094 = vpow2.f32 %v103_v35 }
 0x19c   :  { %v100_v37 = vpop.xlane.xlu1 %99 }
 0x19d   :  { %v102_v38 = vsub.f32 %v94_v24, %v100_v37 }
 0x19f   :  { %v1093_v39 = vpop.eup %1092  ;;  %v105_v40 = vmul.f32 1.442695, %v102_v38 }
 0x1a0   :  { %v1095_v41 = vpop.eup %1094  ;;  %1037 = vmatmul.msk.f32.gmra.mxu3 %vm59_vm1, %v1093_v39  ;;  %v262_v42 = vsel %vm59_vm1, %v1093_v39, 0.0 }
 0x1a1   :  { %1096 = vpow2.f32 %v105_v40  ;;  %1026 = vmatmul.msk.f32.vlgmr.msra.gmra.mxu2 %vm59_vm1, %v1095_v41  ;;  %263 = vadd.xlane.f32.xlu0 %v262_v42  ;;  %v107_v43 = vsel %vm59_vm1, %v1095_v41, 0.0 }
 0x1a2   :  { %108 = vadd.xlane.f32.xlu2 %v107_v43  ;;  %548 = vmatpush.msra.mxu2 %v1176_v0 }
 0x1a7   :  { %v1097_v44 = vpop.eup %1096 }
 0x1a8   :  { %v110_v45 = vsel %vm59_vm1, %v1097_v44, 0.0 }
 0x1a9   :  { %1027 = vmatmul.msk.f32.gmra.mxu2 %vm59_vm1, %v1097_v44  ;;  %111 = vadd.xlane.f32.xlu1 %v110_v45 }
 0x20c   :  { %v261_v49 = vpop.xlane.xlu2 %260 }
 0x20d   :  { %1098 = vrcp.f32 %v261_v49  ;;  %v305_v56 = vand.u32 2147483648, %v261_v49  ;;  %v303_v58 = vand.u32 2147483647, %v261_v49  ;;  %vm299_vm7 = vweird.f32 %v261_v49 }
 0x20f   :  { %v306_v62 = vor.u32 1.1754944e-38, %v305_v56  ;;  %vm304_vm9 = vcmp.eq.f32.partialorder %v303_v58, 8.507059e+37 }
 0x213   :  { %v1099_v51 = vpop.eup %1098 }
 0x214   :  { %v295_v52 = vmul.f32 %v1099_v51, %v261_v49  ;;  %v264_v53 = vpop.xlane.xlu0 %263  ;;  %vm300_vm6 = vweird.f32 %v1099_v51 }
 0x215   :  { %v109_v54 = vpop.xlane.xlu2 %108  ;;  %1100 = vrcp.f32 %v264_v53  ;;  %vm301_vm8 = vmor %vm299_vm7, %vm300_vm6  ;;  %v317_v11 = vand.u32 2147483647, %v264_v53  ;;  %v319_v12 = vand.u32 2147483648, %v264_v53  ;;  %vm313_vm12 = vweird.f32 %v264_v53 }
 0x216   :  { %v296_v55 = vsub.f32 1.0, %v295_v52  ;;  %1102 = vrcp.f32 %v109_v54  ;;  %v153_v14 = vand.u32 2147483648, %v109_v54  ;;  %v151_v18 = vand.u32 2147483647, %v109_v54 }
 0x217   :  { %vm147_vm14 = vweird.f32 %v109_v54  ;;  %vm318_vm2 = vcmp.eq.f32.partialorder %v317_v11, 8.507059e+37  ;;  %v320_v23 = vor.u32 1.1754944e-38, %v319_v12 }
 0x218   :  { %v297_v57 = vmul.f32 %v1099_v51, %v296_v55  ;;  %v154_v26 = vor.u32 1.1754944e-38, %v153_v14  ;;  %vm152_vm4 = vcmp.eq.f32.partialorder %v151_v18, 8.507059e+37 }
 0x21a   :  { %v298_v59 = vadd.f32 %v1099_v51, %v297_v57 }
 0x21b   :  { %v1101_v60 = vpop.eup %1100  ;;  %v288_v61 = vpop.f32.mrf.mxu3 }
 0x21c   :  { %v1103_v63 = vpop.eup %1102  ;;  %v309_v0 = vmul.f32 %v1101_v60, %v264_v53  ;;  %v302_v2 = vsel %vm301_vm8, %v1099_v51, %v298_v59  ;;  %v112_v4 = vpop.xlane.xlu1 %111  ;;  %vm314_vm10 = vweird.f32 %v1101_v60 }
 0x21d   :  { %v143_v5 = vmul.f32 %v1103_v63, %v109_v54  ;;  %v307_v6 = vsel %vm304_vm9, %v306_v62, %v302_v2  ;;  %1104 = vrcp.f32 %v112_v4  ;;  %vm148_vm11 = vweird.f32 %v1103_v63  ;;  %vm315_vm15 = vmor %vm313_vm12, %vm314_vm10  ;;  %v1050_v2 = vld [vmem:[%s1378_s0 + $0x10] sm:$0xff] }
 0x21e   :  { %v310_v7 = vsub.f32 1.0, %v309_v0  ;;  %v322_v8 = vmul.f32 %v307_v6, %v288_v61  ;;  %vm149_vm3 = vmor %vm147_vm14, %vm148_vm11  ;;  %v167_v37 = vand.u32 2147483648, %v112_v4  ;;  %v165_v40 = vand.u32 2147483647, %v112_v4 }
 0x21f   :  { %v144_v10 = vsub.f32 1.0, %v143_v5  ;;  %vm161_vm6 = vweird.f32 %v112_v4 }
 0x220   :  { %v327_v13 = vadd.f32 %v1084_v3, %v322_v8  ;;  %v311_v16 = vmul.f32 %v1101_v60, %v310_v7  ;;  %v168_v45 = vor.u32 1.1754944e-38, %v167_v37  ;;  %vm166_vm10 = vcmp.eq.f32.partialorder %v165_v40, 8.507059e+37 }
 0x221   :  { %v145_v17 = vmul.f32 %v1103_v63, %v144_v10 }
 0x222   :  { %v331_v19 = vmul.f32 0.01, %v327_v13  ;;  %v312_v20 = vadd.f32 %v1101_v60, %v311_v16  ;;  %vm329_vm13 = vcmp.ge.f32.partialorder %v327_v13, 0.0 }
 0x223   :  { %v1105_v21 = vpop.eup %1104  ;;  %v146_v22 = vadd.f32 %v1103_v63, %v145_v17  ;;  %v291_v31 = vpop.f32.mrf.mxu3 }
 0x224   :  { %v157_v24 = vmul.f32 %v1105_v21, %v112_v4  ;;  %v136_v25 = vpop.f32.mrf.mxu2  ;;  %v316_v27 = vsel %vm315_vm15, %v1101_v60, %v312_v20  ;;  %v333_v28 = vsel %vm329_vm13, %v327_v13, %v331_v19  ;;  %vm162_vm5 = vweird.f32 %v1105_v21 }
 0x225   :  { %v150_v29 = vsel %vm149_vm3, %v1103_v63, %v146_v22  ;;  %v321_v32 = vsel %vm318_vm2, %v320_v23, %v316_v27  ;;  %1040 = vmatmul.msk.f32.vlgmr.msrb.gmra.mxu2 %vm59_vm1, %v333_v28  ;;  %vm163_vm8 = vmor %vm161_vm6, %vm162_vm5 }
 0x226   :  { %v158_v33 = vsub.f32 1.0, %v157_v24  ;;  %v155_v34 = vsel %vm152_vm4, %v154_v26, %v150_v29  ;;  %v323_v35 = vmul.f32 %v321_v32, %v291_v31 }
 0x227   :  { %v170_v36 = vmul.f32 %v155_v34, %v136_v25 }
 0x228   :  { %v328_v38 = vadd.f32 %v1084_v3, %v323_v35  ;;  %v159_v39 = vmul.f32 %v1105_v21, %v158_v33  ;;  %v1051_v3 = vld [vmem:[%s1378_s0 + $0x18] sm:$0xff] }
 0x229   :  { %v175_v41 = vadd.f32 %v1085_v30, %v170_v36 }
 0x22a   :  { %v160_v42 = vadd.f32 %v1105_v21, %v159_v39  ;;  %vm330_vm7 = vcmp.ge.f32.partialorder %v328_v38, 0.0  ;;  %v332_v43 = vmul.f32 0.01, %v328_v38 }
 0x22b   :  { %v179_v44 = vmul.f32 0.01, %v175_v41  ;;  %vm177_vm9 = vcmp.ge.f32.partialorder %v175_v41, 0.0 }
 0x22c   :  { %v164_v49 = vsel %vm163_vm8, %v1105_v21, %v160_v42  ;;  %v334_v51 = vsel %vm330_vm7, %v328_v38, %v332_v43  ;;  %v139_v52 = vpop.f32.mrf.mxu2 }
 0x22d   :  { %v169_v53 = vsel %vm166_vm10, %v168_v45, %v164_v49  ;;  %1041 = vmatmul.msk.f32.gmra.mxu2 %vm59_vm1, %v334_v51  ;;  %v181_v54 = vsel %vm177_vm9, %v175_v41, %v179_v44 }
 0x22e   :  { %v171_v55 = vmul.f32 %v169_v53, %v139_v52  ;;  %1042 = vmatmul.msk.f32.vlgmr.msrb.gmra.mxu1 %vm59_vm1, %v181_v54 }
 0x230   :  { %v176_v56 = vadd.f32 %v1085_v30, %v171_v55 }
 0x232   :  { %vm178_vm11 = vcmp.ge.f32.partialorder %v176_v56, 0.0  ;;  %v180_v57 = vmul.f32 0.01, %v176_v56 }
 0x234   :  { %v182_v58 = vsel %vm178_vm11, %v176_v56, %v180_v57 }
 0x235   :  { %1052 = vmatmul.msk.f32.vlgmr.msra.gmra.mxu2 %vm29_vm0, %v1050_v2 }
 0x236   :  { %1043 = vmatmul.msk.f32.gmra.mxu1 %vm59_vm1, %v182_v58 }
 0x23d   :  { %1053 = vmatmul.msk.f32.gmra.mxu2 %vm29_vm0, %v1051_v3 }
 0x2a8   :  { %v361_v59 = vpop.f32.mrf.mxu2 }
 0x2ab   :  { %v390_v60 = vpop.f32.mrf.mxu1 }
 0x2ac   :  { %v391_v0 = vadd.f32 %v390_v60, %v361_v59 }
 0x2b0   :  { %v364_v61 = vpop.f32.mrf.mxu2 }
 0x2b3   :  { %v393_v62 = vpop.f32.mrf.mxu1 }
 0x2b4   :  { %v394_v63 = vadd.f32 %v393_v62, %v364_v61 }
 0x2b6   :  { %1044 = vmatpush.xpose.msk.msra.mxu0 %vm29_vm0, %v394_v63  ;;  %470 = vmatpush.msra.mxu3 %v394_v63 }
 0x2b8   :  { %471 = vmatpush.msra.mxu3 %v391_v0  ;;  %v550_v12 = vpop.f32.mrf.mxu2 }
 0x2ba   :  { %698 = vmatpush.msrb.mxu3 %v1181_v1  ;;  %1045 = vmatpush.xpose.msk.msra.mxu0 %vm29_vm0, %v391_v0 }
 0x2bd   :  { %1046 = vmatmul.msk.f32.vlgmr.msra.gmra.mxu0 %vm29_vm0, %v391_v0 }
 0x2c0   :  { %v553_v16 = vpop.f32.mrf.mxu2 }
 0x2c1   :  { %1054 = vmatpush.xpose.msk.msra.mxu1 %vm59_vm1, %v553_v16  ;;  %629 = vmatpush.msrb.mxu0 %v553_v16 }
 0x2c3   :  { %630 = vmatpush.msrb.mxu0 %v550_v12 }
 0x2c5   :  { %1047 = vmatmul.msk.f32.gmra.mxu0 %vm29_vm0, %v394_v63  ;;  %1055 = vmatpush.xpose.msk.msra.mxu1 %vm59_vm1, %v550_v12 }
 0x2c6   :  { %851 = vmatpush.msra.mxu0 %v1232_v46 }
 0x2c8   :  { %852 = vmatpush.msra.mxu0 %v1238_v47  ;;  %1056 = vmatmul.msk.f32.vlgmr.msra.gmra.mxu1 %vm59_vm1, %v550_v12 }
 0x2d0   :  { %1057 = vmatmul.msk.f32.gmra.mxu1 %vm59_vm1, %v553_v16 }
 0x33a   :  { %v420_v4 = vpop.f32.mrf.mxu0 }
 0x33b   :  { %v426_v1 = vmul.f32 %v420_v4, %v1206_v9 }
 0x33d   :  { %vm428_vm12 = vcmp.eq.f32.partialorder %v426_v1, 0.0 }
 0x33e   :  { %v430_v5 = vsel %vm428_vm12, -1e+16, %v426_v1 }
 0x33f   :  { %v432_v6 = vsel %vm59_vm1, %v430_v5, -inf }
 0x340   :  { %433 = vmax.xlane.f32.xlu2 %v432_v6 }
 0x342   :  { %v423_v7 = vpop.f32.mrf.mxu0 }
 0x343   :  { %v427_v8 = vmul.f32 %v423_v7, %v1214_v15 }
 0x345   :  { %vm429_vm13 = vcmp.eq.f32.partialorder %v427_v8, 0.0  ;;  %v579_v47 = vpop.f32.mrf.mxu1 }
 0x346   :  { %v431_v10 = vsel %vm429_vm13, -1e+16, %v427_v8  ;;  %v585_v22 = vmul.f32 %v579_v47, %v1206_v9 }
 0x347   :  { %v435_v11 = vsel %vm59_vm1, %v431_v10, -inf }
 0x348   :  { %436 = vmax.xlane.f32.xlu0 %v435_v11  ;;  %vm587_vm14 = vcmp.eq.f32.partialorder %v585_v22, 0.0 }
 0x349   :  { %v589_v23 = vsel %vm587_vm14, -1e+16, %v585_v22 }
 0x3b3   :  { %v434_v13 = vpop.xlane.xlu2 %433 }
 0x3b4   :  { %v438_v14 = vsub.f32 %v430_v5, %v434_v13 }
 0x3b6   :  { %v440_v17 = vmul.f32 1.442695, %v438_v14  ;;  %v1086_v14 = vld [vmem:[%s1380_s2] ss:$0 sm:$0xff] }
 0x3b8   :  { %1106 = vpow2.f32 %v440_v17 }
 0x3bb   :  { %v437_v18 = vpop.xlane.xlu0 %436 }
 0x3bc   :  { %v439_v19 = vsub.f32 %v431_v10, %v437_v18 }
 0x3be   :  { %v1286_v20 = vpop.eup %1106  ;;  %v442_v21 = vmul.f32 1.442695, %v439_v19 }
 0x3bf   :  { %1048 = vmatmul.msk.f32.vlgmr.msra.gmra.mxu3 %vm59_vm1, %v1286_v20 }
 0x3c0   :  { %1108 = vpow2.f32 %v442_v21  ;;  %880 = vmatpush.msra.mxu3 %v1245_v48  ;;  %v591_v48 = vsel %vm59_vm1, %v589_v23, -inf }
 0x3c1   :  { %592 = vmax.xlane.f32.xlu1 %v591_v48 }
 0x3c2   :  { %881 = vmatpush.msra.mxu3 %v1251_v50  ;;  %v582_v50 = vpop.f32.mrf.mxu1 }
 0x3c3   :  { %v586_v25 = vmul.f32 %v582_v50, %v1214_v15 }
 0x3c5   :  { %vm588_vm15 = vcmp.eq.f32.partialorder %v586_v25, 0.0 }
 0x3c6   :  { %v1293_v46 = vpop.eup %1108  ;;  %v590_v26 = vsel %vm588_vm15, -1e+16, %v586_v25 }
 0x3c7   :  { %1049 = vmatmul.msk.f32.gmra.mxu3 %vm59_vm1, %v1293_v46  ;;  %v594_v27 = vsel %vm59_vm1, %v590_v26, -inf }
 0x3c8   :  { %595 = vmax.xlane.f32.xlu0 %v594_v27 }
 0x3cf   :  { %1062 = vmatmul.msk.f32.vlgmr.msrb.gmra.mxu3 %vm29_vm0, %v1050_v2 }
 0x3d7   :  { %1063 = vmatmul.msk.f32.gmra.mxu3 %vm29_vm0, %v1051_v3 }
 0x434   :  { %v593_v31 = vpop.xlane.xlu1 %592 }
 0x435   :  { %v597_v32 = vsub.f32 %v589_v23, %v593_v31  ;;  %v444_v23 = vsel %vm59_vm1, %v1286_v20, 0.0 }
 0x437   :  { %v599_v33 = vmul.f32 1.442695, %v597_v32 }
 0x439   :  { %1110 = vpow2.f32 %v599_v33 }
 0x43b   :  { %v596_v34 = vpop.xlane.xlu0 %595 }
 0x43c   :  { %v598_v35 = vsub.f32 %v590_v26, %v596_v34 }
 0x43e   :  { %v601_v36 = vmul.f32 1.442695, %v598_v35 }
 0x43f   :  { %v1111_v37 = vpop.eup %1110 }
 0x440   :  { %1112 = vpow2.f32 %v601_v36  ;;  %1058 = vmatmul.msk.f32.vlgmr.msrb.gmra.mxu0 %vm59_vm1, %v1111_v37  ;;  %v603_v49 = vsel %vm59_vm1, %v1111_v37, 0.0 }
 0x442   :  { %v1301_v24 = vpop.f32.mrf.mxu3 }
 0x446   :  { %v1113_v38 = vpop.eup %1112 }
 0x447   :  { %v606_v52 = vsel %vm59_vm1, %v1113_v38, 0.0 }
 0x448   :  { %1059 = vmatmul.msk.f32.gmra.mxu0 %vm59_vm1, %v1113_v38 }
 0x44a   :  { %v1305_v28 = vpop.f32.mrf.mxu3 }
 0x452   :  { %v700_v29 = vpop.f32.mrf.mxu3 }
 0x45a   :  { %v703_v30 = vpop.f32.mrf.mxu3 }
 0x45b   :  { %1064 = vmatpush.xpose.msk.msrb.mxu2 %vm59_vm1, %v703_v30  ;;  %779 = vmatpush.msrb.mxu1 %v703_v30 }
 0x45d   :  { %780 = vmatpush.msrb.mxu1 %v700_v29 }
 0x45f   :  { %1065 = vmatpush.xpose.msk.msrb.mxu2 %vm59_vm1, %v700_v29 }
 0x462   :  { %1066 = vmatmul.msk.f32.vlgmr.msrb.gmra.mxu2 %vm59_vm1, %v700_v29 }
 0x46a   :  { %1067 = vmatmul.msk.f32.gmra.mxu2 %vm59_vm1, %v703_v30 }
 0x4bd   :  { %v632_v10 = vpop.f32.mrf.mxu0 }
 0x4c5   :  { %v635_v29 = vpop.f32.mrf.mxu0 }
 0x4e5   :  { %v729_v39 = vpop.f32.mrf.mxu2 }
 0x4e6   :  { %v735_v40 = vmul.f32 %v729_v39, %v1206_v9 }
 0x4e8   :  { %vm737_vm2 = vcmp.eq.f32.partialorder %v735_v40, 0.0 }
 0x4e9   :  { %v739_v41 = vsel %vm737_vm2, -1e+16, %v735_v40 }
 0x4ea   :  { %v741_v42 = vsel %vm59_vm1, %v739_v41, -inf }
 0x4eb   :  { %742 = vmax.xlane.f32.xlu2 %v741_v42 }
 0x4ed   :  { %v732_v43 = vpop.f32.mrf.mxu2 }
 0x4ee   :  { %v736_v44 = vmul.f32 %v732_v43, %v1214_v15 }
 0x4f0   :  { %vm738_vm3 = vcmp.eq.f32.partialorder %v736_v44, 0.0 }
 0x4f1   :  { %v740_v45 = vsel %vm738_vm3, -1e+16, %v736_v44 }
 0x4f2   :  { %v744_v51 = vsel %vm59_vm1, %v740_v45, -inf }
 0x4f3   :  { %604 = vadd.xlane.f32.xlu2 %v603_v49  ;;  %745 = vmax.xlane.f32.xlu1 %v744_v51  ;;  %v1087_v51 = vld [vmem:[%s1380_s2 + $0x1] ss:$0 sm:$0xff] }
 0x4fb   :  { %607 = vadd.xlane.f32.xlu1 %v606_v52 }
 0x55e   :  { %v743_v53 = vpop.xlane.xlu2 %742 }
 0x55f   :  { %v747_v54 = vsub.f32 %v739_v41, %v743_v53 }
 0x561   :  { %v749_v55 = vmul.f32 1.442695, %v747_v54 }
 0x563   :  { %1114 = vpow2.f32 %v749_v55 }
 0x566   :  { %v605_v56 = vpop.xlane.xlu2 %604  ;;  %v746_v57 = vpop.xlane.xlu1 %745 }
 0x567   :  { %1116 = vrcp.f32 %v605_v56  ;;  %v748_v58 = vsub.f32 %v740_v45, %v746_v57  ;;  %v649_v3 = vand.u32 2147483648, %v605_v56  ;;  %v647_v5 = vand.u32 2147483647, %v605_v56 }
 0x568   :  { %vm643_vm5 = vweird.f32 %v605_v56 }
 0x569   :  { %v1115_v59 = vpop.eup %1114  ;;  %v751_v60 = vmul.f32 1.442695, %v748_v58  ;;  %v650_v11 = vor.u32 1.1754944e-38, %v649_v3  ;;  %vm648_vm7 = vcmp.eq.f32.partialorder %v647_v5, 8.507059e+37 }
 0x56a   :  { %1068 = vmatmul.msk.f32.vlgmr.msrb.gmra.mxu1 %vm59_vm1, %v1115_v59  ;;  %v753_v61 = vsel %vm59_vm1, %v1115_v59, 0.0 }
 0x56b   :  { %754 = vadd.xlane.f32.xlu0 %v753_v61  ;;  %1118 = vpow2.f32 %v751_v60 }
 0x56d   :  { %v1117_v62 = vpop.eup %1116 }
 0x56e   :  { %v639_v63 = vmul.f32 %v1117_v62, %v605_v56  ;;  %v608_v0 = vpop.xlane.xlu1 %607  ;;  %vm644_vm4 = vweird.f32 %v1117_v62 }
 0x56f   :  { %1120 = vrcp.f32 %v608_v0  ;;  %vm645_vm6 = vmor %vm643_vm5, %vm644_vm4  ;;  %v663_v19 = vand.u32 2147483648, %v608_v0  ;;  %v661_v47 = vand.u32 2147483647, %v608_v0  ;;  %vm657_vm9 = vweird.f32 %v608_v0 }
 0x570   :  { %v640_v2 = vsub.f32 1.0, %v639_v63 }
 0x571   :  { %v1119_v4 = vpop.eup %1118  ;;  %v664_v25 = vor.u32 1.1754944e-38, %v663_v19  ;;  %vm662_vm12 = vcmp.eq.f32.partialorder %v661_v47, 8.507059e+37  ;;  %v1337_v19 = vld [vmem:[%s1382_s4] ss:$0 sm:$0xff] }
 0x572   :  { %v641_v1 = vmul.f32 %v1117_v62, %v640_v2  ;;  %1069 = vmatmul.msk.f32.gmra.mxu1 %vm59_vm1, %v1119_v4  ;;  %v756_v6 = vsel %vm59_vm1, %v1119_v4, 0.0 }
 0x573   :  { %757 = vadd.xlane.f32.xlu2 %v756_v6 }
 0x574   :  { %v642_v7 = vadd.f32 %v1117_v62, %v641_v1 }
 0x575   :  { %v1121_v8 = vpop.eup %1120 }
 0x576   :  { %v646_v12 = vsel %vm645_vm6, %v1117_v62, %v642_v7  ;;  %v653_v13 = vmul.f32 %v1121_v8, %v608_v0  ;;  %vm658_vm8 = vweird.f32 %v1121_v8 }
 0x577   :  { %v651_v16 = vsel %vm648_vm7, %v650_v11, %v646_v12  ;;  %vm659_vm11 = vmor %vm657_vm9, %vm658_vm8 }
 0x578   :  { %v654_v17 = vsub.f32 1.0, %v653_v13  ;;  %v666_v18 = vmul.f32 %v651_v16, %v632_v10 }
 0x57a   :  { %v655_v21 = vmul.f32 %v1121_v8, %v654_v17  ;;  %v671_v22 = vadd.f32 %v1086_v14, %v666_v18 }
 0x57b   :  { %445 = vadd.xlane.f32.xlu2 %v444_v23 }
 0x57c   :  { %v656_v48 = vadd.f32 %v1121_v8, %v655_v21  ;;  %vm673_vm10 = vcmp.ge.f32.partialorder %v671_v22, 0.0  ;;  %v675_v50 = vmul.f32 0.01, %v671_v22 }
 0x57e   :  { %v677_v26 = vsel %vm673_vm10, %v671_v22, %v675_v50  ;;  %v660_v27 = vsel %vm659_vm11, %v1121_v8, %v656_v48 }
 0x57f   :  { %1074 = vmatmul.msk.f32.vlgmr.msra.gmra.mxu3 %vm59_vm1, %v677_v26  ;;  %v665_v30 = vsel %vm662_vm12, %v664_v25, %v660_v27 }
 0x580   :  { %v667_v31 = vmul.f32 %v665_v30, %v635_v29 }
 0x582   :  { %v672_v32 = vadd.f32 %v1086_v14, %v667_v31 }
 0x584   :  { %vm674_vm13 = vcmp.ge.f32.partialorder %v672_v32, 0.0  ;;  %v676_v33 = vmul.f32 0.01, %v672_v32 }
 0x586   :  { %v678_v34 = vsel %vm674_vm13, %v672_v32, %v676_v33 }
 0x587   :  { %1075 = vmatmul.msk.f32.gmra.mxu3 %vm59_vm1, %v678_v34 }
 0x5de   :  { %v755_v20 = vpop.xlane.xlu0 %754 }
 0x5df   :  { %1122 = vrcp.f32 %v755_v20  ;;  %v799_v39 = vand.u32 2147483648, %v755_v20  ;;  %v797_v41 = vand.u32 2147483647, %v755_v20  ;;  %vm793_vm15 = vweird.f32 %v755_v20 }
 0x5e1   :  { %v800_v43 = vor.u32 1.1754944e-38, %v799_v39  ;;  %vm798_vm3 = vcmp.eq.f32.partialorder %v797_v41, 8.507059e+37 }
 0x5e5   :  { %v1123_v35 = vpop.eup %1122 }
 0x5e6   :  { %v789_v36 = vmul.f32 %v1123_v35, %v755_v20  ;;  %v758_v37 = vpop.xlane.xlu2 %757  ;;  %vm794_vm14 = vweird.f32 %v1123_v35 }
 0x5e7   :  { %1124 = vrcp.f32 %v758_v37  ;;  %vm795_vm2 = vmor %vm793_vm15, %vm794_vm14  ;;  %v782_v45 = vpop.f32.mrf.mxu1  ;;  %v813_v58 = vand.u32 2147483648, %v758_v37  ;;  %v811_v60 = vand.u32 2147483647, %v758_v37  ;;  %vm807_vm6 = vweird.f32 %v758_v37 }
 0x5e8   :  { %v790_v38 = vsub.f32 1.0, %v789_v36  ;;  %v447_v36 = vsel %vm59_vm1, %v1293_v46, 0.0 }
 0x5e9   :  { %v814_v0 = vor.u32 1.1754944e-38, %v813_v58  ;;  %vm812_vm8 = vcmp.eq.f32.partialorder %v811_v60, 8.507059e+37 }
 0x5ea   :  { %v791_v40 = vmul.f32 %v1123_v35, %v790_v38 }
 0x5ec   :  { %v792_v42 = vadd.f32 %v1123_v35, %v791_v40 }
 0x5ed   :  { %v1125_v44 = vpop.eup %1124 }
 0x5ee   :  { %v796_v49 = vsel %vm795_vm2, %v1123_v35, %v792_v42  ;;  %v803_v52 = vmul.f32 %v1125_v44, %v758_v37  ;;  %v446_v54 = vpop.xlane.xlu2 %445  ;;  %vm808_vm4 = vweird.f32 %v1125_v44 }
 0x5ef   :  { %v801_v53 = vsel %vm798_vm3, %v800_v43, %v796_v49  ;;  %1126 = vrcp.f32 %v446_v54  ;;  %vm809_vm7 = vmor %vm807_vm6, %vm808_vm4  ;;  %v785_v1 = vpop.f32.mrf.mxu1  ;;  %v490_v8 = vand.u32 2147483648, %v446_v54  ;;  %v488_v11 = vand.u32 2147483647, %v446_v54 }
 0x5f0   :  { %v816_v55 = vmul.f32 %v801_v53, %v782_v45  ;;  %v804_v56 = vsub.f32 1.0, %v803_v52  ;;  %vm484_vm10 = vweird.f32 %v446_v54 }
 0x5f1   :  { %v491_v16 = vor.u32 1.1754944e-38, %v490_v8  ;;  %vm489_vm13 = vcmp.eq.f32.partialorder %v488_v11, 8.507059e+37 }
 0x5f2   :  { %v821_v57 = vadd.f32 %v1087_v51, %v816_v55  ;;  %v805_v59 = vmul.f32 %v1125_v44, %v804_v56 }
 0x5f4   :  { %vm823_vm5 = vcmp.ge.f32.partialorder %v821_v57, 0.0  ;;  %v825_v61 = vmul.f32 0.01, %v821_v57  ;;  %v806_v62 = vadd.f32 %v1125_v44, %v805_v59 }
 0x5f5   :  { %v1127_v63 = vpop.eup %1126 }
 0x5f6   :  { %v827_v2 = vsel %vm823_vm5, %v821_v57, %v825_v61  ;;  %v480_v3 = vmul.f32 %v1127_v63, %v446_v54  ;;  %v810_v4 = vsel %vm809_vm7, %v1125_v44, %v806_v62  ;;  %vm485_vm9 = vweird.f32 %v1127_v63 }
 0x5f7   :  { %1072 = vmatmul.msk.f32.vlgmr.msra.gmra.mxu0 %vm59_vm1, %v827_v2  ;;  %v815_v5 = vsel %vm812_vm8, %v814_v0, %v810_v4  ;;  %vm486_vm12 = vmor %vm484_vm10, %vm485_vm9 }
 0x5f8   :  { %v481_v6 = vsub.f32 1.0, %v480_v3  ;;  %v817_v7 = vmul.f32 %v815_v5, %v785_v1 }
 0x5fa   :  { %v482_v10 = vmul.f32 %v1127_v63, %v481_v6  ;;  %v822_v12 = vadd.f32 %v1087_v51, %v817_v7 }
 0x5fc   :  { %v483_v13 = vadd.f32 %v1127_v63, %v482_v10  ;;  %vm824_vm11 = vcmp.ge.f32.partialorder %v822_v12, 0.0  ;;  %v826_v14 = vmul.f32 0.01, %v822_v12 }
 0x5fe   :  { %v487_v17 = vsel %vm486_vm12, %v1127_v63, %v483_v13  ;;  %v828_v18 = vsel %vm824_vm11, %v822_v12, %v826_v14  ;;  %v1089_v13 = vld [vmem:[%s1382_s4] ss:$0 sm:$0xff] }
 0x5ff   :  { %v492_v21 = vsel %vm489_vm13, %v491_v16, %v487_v17  ;;  %1073 = vmatmul.msk.f32.gmra.mxu0 %vm59_vm1, %v828_v18 }
 0x600   :  { %v507_v47 = vmul.f32 %v492_v21, %v1301_v24 }
 0x602   :  { %v512_v22 = vadd.f32 %v1337_v19, %v507_v47  ;;  %v883_v50 = vpop.f32.mrf.mxu3 }
 0x604   :  { %vm514_vm14 = vcmp.ge.f32.partialorder %v512_v22, 0.0  ;;  %v516_v23 = vmul.f32 0.01, %v512_v22 }
 0x606   :  { %v518_v48 = vsel %vm514_vm14, %v512_v22, %v516_v23 }
 0x607   :  { %520 = vst.msk [vmem:[%s1383_s6] sm:$0xff] %vm29_vm0, %v518_v48 }
 0x60a   :  { %v886_v26 = vpop.f32.mrf.mxu3 }
 0x674   :  { %v854_v25 = vpop.f32.mrf.mxu0 }
 0x675   :  { %v884_v30 = vadd.f32 %v883_v50, %v854_v25 }
 0x67c   :  { %v857_v27 = vpop.f32.mrf.mxu0 }
 0x67d   :  { %v887_v29 = vadd.f32 %v886_v26, %v857_v27 }
 0x67f   :  { %1076 = vmatpush.xpose.msk.msra.mxu2 %vm29_vm0, %v887_v29  ;;  %963 = vmatpush.msra.mxu1 %v887_v29 }
 0x681   :  { %964 = vmatpush.msra.mxu1 %v884_v30 }
 0x683   :  { %1077 = vmatpush.xpose.msk.msra.mxu2 %vm29_vm0, %v884_v30 }
 0x686   :  { %1078 = vmatmul.msk.f32.vlgmr.msra.gmra.mxu2 %vm29_vm0, %v884_v30 }
 0x68e   :  { %1079 = vmatmul.msk.f32.gmra.mxu2 %vm29_vm0, %v887_v29 }
 0x709   :  { %v913_v24 = vpop.f32.mrf.mxu2 }
 0x70a   :  { %v919_v31 = vmul.f32 %v913_v24, %v1206_v9 }
 0x70c   :  { %vm921_vm15 = vcmp.eq.f32.partialorder %v919_v31, 0.0 }
 0x70d   :  { %v923_v32 = vsel %vm921_vm15, -1e+16, %v919_v31 }
 0x70e   :  { %v925_v33 = vsel %vm59_vm1, %v923_v32, -inf }
 0x70f   :  { %926 = vmax.xlane.f32.xlu0 %v925_v33 }
 0x711   :  { %v916_v34 = vpop.f32.mrf.mxu2 }
 0x712   :  { %v920_v20 = vmul.f32 %v916_v34, %v1214_v15 }
 0x714   :  { %vm922_vm2 = vcmp.eq.f32.partialorder %v920_v20, 0.0 }
 0x715   :  { %v924_v35 = vsel %vm922_vm2, -1e+16, %v920_v20 }
 0x716   :  { %v928_v37 = vsel %vm59_vm1, %v924_v35, -inf }
 0x717   :  { %448 = vadd.xlane.f32.xlu0 %v447_v36  ;;  %929 = vmax.xlane.f32.xlu1 %v928_v37 }
 0x782   :  { %v927_v38 = vpop.xlane.xlu0 %926 }
 0x783   :  { %v931_v39 = vsub.f32 %v923_v32, %v927_v38 }
 0x785   :  { %v933_v9 = vmul.f32 1.442695, %v931_v39 }
 0x787   :  { %1128 = vpow2.f32 %v933_v9 }
 0x78a   :  { %v449_v40 = vpop.xlane.xlu0 %448  ;;  %v930_v41 = vpop.xlane.xlu1 %929 }
 0x78b   :  { %1130 = vrcp.f32 %v449_v40  ;;  %v932_v42 = vsub.f32 %v924_v35, %v930_v41  ;;  %v504_v51 = vand.u32 2147483648, %v449_v40  ;;  %v502_v54 = vand.u32 2147483647, %v449_v40 }
 0x78c   :  { %vm498_vm4 = vweird.f32 %v449_v40 }
 0x78d   :  { %v1129_v43 = vpop.eup %1128  ;;  %v935_v44 = vmul.f32 1.442695, %v932_v42  ;;  %v505_v57 = vor.u32 1.1754944e-38, %v504_v51  ;;  %vm503_vm6 = vcmp.eq.f32.partialorder %v502_v54, 8.507059e+37 }
 0x78e   :  { %1080 = vmatmul.msk.f32.vlgmr.msra.gmra.mxu1 %vm59_vm1, %v1129_v43  ;;  %v937_v15 = vsel %vm59_vm1, %v1129_v43, 0.0 }
 0x78f   :  { %938 = vadd.xlane.f32.xlu1 %v937_v15  ;;  %1132 = vpow2.f32 %v935_v44 }
 0x791   :  { %v1131_v46 = vpop.eup %1130 }
 0x792   :  { %v494_v45 = vmul.f32 %v1131_v46, %v449_v40  ;;  %vm499_vm3 = vweird.f32 %v1131_v46 }
 0x793   :  { %vm500_vm5 = vmor %vm498_vm4, %vm499_vm3 }
 0x794   :  { %v495_v49 = vsub.f32 1.0, %v494_v45 }
 0x795   :  { %v1133_v52 = vpop.eup %1132 }
 0x796   :  { %v496_v53 = vmul.f32 %v1131_v46, %v495_v49  ;;  %1081 = vmatmul.msk.f32.gmra.mxu1 %vm59_vm1, %v1133_v52  ;;  %v940_v55 = vsel %vm59_vm1, %v1133_v52, 0.0 }
 0x797   :  { %941 = vadd.xlane.f32.xlu2 %v940_v55 }
 0x798   :  { %v497_v56 = vadd.f32 %v1131_v46, %v496_v53 }
 0x79a   :  { %v501_v58 = vsel %vm500_vm5, %v1131_v46, %v497_v56 }
 0x79b   :  { %v506_v59 = vsel %vm503_vm6, %v505_v57, %v501_v58 }
 0x79c   :  { %v508_v60 = vmul.f32 %v506_v59, %v1305_v28 }
 0x79e   :  { %v513_v61 = vadd.f32 %v1337_v19, %v508_v60 }
 0x7a0   :  { %vm515_vm7 = vcmp.ge.f32.partialorder %v513_v61, 0.0  ;;  %v517_v62 = vmul.f32 0.01, %v513_v61 }
 0x7a2   :  { %v519_v63 = vsel %vm515_vm7, %v513_v61, %v517_v62 }
 0x7a3   :  { %521 = vst.msk [vmem:[%s1383_s6 + $0x8] sm:$0xff] %vm29_vm0, %v519_v63 }
 0x802   :  { %v939_v0 = vpop.xlane.xlu1 %938 }
 0x803   :  { %1134 = vrcp.f32 %v939_v0  ;;  %v983_v5 = vand.u32 2147483648, %v939_v0  ;;  %v981_v28 = vand.u32 2147483647, %v939_v0  ;;  %vm977_vm8 = vweird.f32 %v939_v0 }
 0x805   :  { %v984_v8 = vor.u32 1.1754944e-38, %v983_v5  ;;  %vm982_vm10 = vcmp.eq.f32.partialorder %v981_v28, 8.507059e+37 }
 0x809   :  { %v1135_v2 = vpop.eup %1134 }
 0x80a   :  { %v973_v3 = vmul.f32 %v1135_v2, %v939_v0  ;;  %v942_v4 = vpop.xlane.xlu2 %941  ;;  %vm978_vm1 = vweird.f32 %v1135_v2 }
 0x80b   :  { %1136 = vrcp.f32 %v942_v4  ;;  %vm979_vm9 = vmor %vm977_vm8, %vm978_vm1  ;;  %v966_v11 = vpop.f32.mrf.mxu1  ;;  %v997_v19 = vand.u32 2147483648, %v942_v4  ;;  %v995_v22 = vand.u32 2147483647, %v942_v4  ;;  %vm991_vm13 = vweird.f32 %v942_v4 }
 0x80c   :  { %v974_v1 = vsub.f32 1.0, %v973_v3 }
 0x80d   :  { %v998_v25 = vor.u32 1.1754944e-38, %v997_v19  ;;  %vm996_vm15 = vcmp.eq.f32.partialorder %v995_v22, 8.507059e+37 }
 0x80e   :  { %v975_v6 = vmul.f32 %v1135_v2, %v974_v1 }
 0x810   :  { %v976_v7 = vadd.f32 %v1135_v2, %v975_v6 }
 0x811   :  { %v1137_v10 = vpop.eup %1136 }
 0x812   :  { %v980_v12 = vsel %vm979_vm9, %v1135_v2, %v976_v7  ;;  %v987_v14 = vmul.f32 %v1137_v10, %v942_v4  ;;  %vm992_vm11 = vweird.f32 %v1137_v10 }
 0x813   :  { %v985_v16 = vsel %vm982_vm10, %v984_v8, %v980_v12  ;;  %vm993_vm14 = vmor %vm991_vm13, %vm992_vm11  ;;  %v969_v27 = vpop.f32.mrf.mxu1 }
 0x814   :  { %v1000_v17 = vmul.f32 %v985_v16, %v966_v11  ;;  %v988_v18 = vsub.f32 1.0, %v987_v14 }
 0x816   :  { %v1005_v21 = vadd.f32 %v1089_v13, %v1000_v17  ;;  %v989_v47 = vmul.f32 %v1137_v10, %v988_v18 }
 0x818   :  { %vm1007_vm12 = vcmp.ge.f32.partialorder %v1005_v21, 0.0  ;;  %v1009_v23 = vmul.f32 0.01, %v1005_v21  ;;  %v990_v48 = vadd.f32 %v1137_v10, %v989_v47 }
 0x81a   :  { %v1011_v50 = vsel %vm1007_vm12, %v1005_v21, %v1009_v23  ;;  %v994_v26 = vsel %vm993_vm14, %v1137_v10, %v990_v48 }
 0x81b   :  { %1082 = vst.msk [vmem:[%s1383_s6 + $0x10] sm:$0xff] %vm29_vm0, %v1011_v50  ;;  %v999_v29 = vsel %vm996_vm15, %v998_v25, %v994_v26 }
 0x81c   :  { %v1001_v30 = vmul.f32 %v999_v29, %v969_v27 }
 0x81e   :  { %v1006_v24 = vadd.f32 %v1089_v13, %v1001_v30 }
 0x820   :  { %vm1008_vm2 = vcmp.ge.f32.partialorder %v1006_v24, 0.0  ;;  %v1010_v31 = vmul.f32 0.01, %v1006_v24 }
 0x822   :  { %v1012_v32 = vsel %vm1008_vm2, %v1006_v24, %v1010_v31 }
 0x823   :  { %1083 = vst.msk [vmem:[%s1383_s6 + $0x18] sm:$0xff] %vm29_vm0, %v1012_v32 }

</bundles_post_ra>
